<compile_context>
chip_gen: v5e
topology: v5e:2x2
jax: 0.10.0
libtpu: 0.0.40
codegen_flags: <defaults>
</compile_context>

<pallas_src>
import functools

import jax
import jax.numpy as jnp
from jax import lax
from jax.experimental import pallas as pl
from jax.experimental.pallas import tpu as pltpu


def _round_up(x, m):
    return (x + m - 1) // m * m


def _bd_conv_kernel(x_ref, w_ref, b_ref, o_ref):
    # x_ref: (1, G*K, col_tile)   im2col slab (lane-dense, col_tile % 128 == 0)
    # w_ref: (1, G*out_ch, G*K)   block-diagonal packed per-group weights
    # b_ref: (1, G*out_ch, 1)
    # o_ref: (1, G*out_ch, col_tile)
    acc = jnp.dot(w_ref[0], x_ref[0], preferred_element_type=jnp.float32)
    o_ref[0] = (acc + b_ref[0].astype(jnp.float32)).astype(o_ref.dtype)


def _pick_tiles(b_i, out_ch, K, n_cols_raw, itemsize,
                *, vmem_budget=40 * 1024 * 1024):
    """Pick (G, col_tile): groups packed per step and 128-multiple column tile."""
    # Largest divisor of b_i keeping M <= 128 (v5e-friendly) and packed K <= 256.
    G = 1
    for d in range(b_i, 0, -1):
        if b_i % d == 0 and d * out_ch <= 128 and d * K <= 256:
            G = d
            break
    M, GK = G * out_ch, G * K
    # VMEM per column: double-buffered x block + out block, plus the f32 result row.
    per_col = 2 * (GK + M) * itemsize + 4 * M
    fixed = 2 * (M * GK + M) * itemsize            # weight + bias blocks (dbl-buffered)
    max_cols = max(128, ((vmem_budget - fixed) // max(per_col, 1)) // 128 * 128)
    col_tile = min(_round_up(n_cols_raw, 128), max_cols, 8192)
    return G, col_tile


def batch_conv1d(x, weight, bias, *, stride=1, padding=0, dilation=1):
    """Pallas BatchConv1d.

    x:      (b_i, b_j, c_in, h)
    weight: (b_i, out_ch, c_in, ksize)
    bias:   (b_i, out_ch)
    returns (b_i, b_j, out_ch, l_out)
    """
    b_i, b_j, c_in, h = x.shape
    _, out_ch, _, ksize = weight.shape
    h_pad = h + 2 * padding
    l_out = (h_pad - dilation * (ksize - 1) - 1) // stride + 1
    K = ksize * c_in
    n_cols_raw = b_j * l_out
    itemsize = jnp.dtype(x.dtype).itemsize

    G, col_tile = _pick_tiles(b_i, out_ch, K, n_cols_raw, itemsize)
    nb = b_i // G                                   # grid blocks over groups
    M = G * out_ch
    GK = G * K
    n_col_tiles = pl.cdiv(n_cols_raw, col_tile)
    n_cols_total = n_col_tiles * col_tile           # 128-multiple, lane-dense

    # ---- wrapper-side layout (XLA, amortized over the whole call) -------------
    # im2col along the contraction dim: rows ordered (tap kk, channel c).
    x_f = jnp.transpose(x, (0, 2, 1, 3))                            # (b_i, c_in, b_j, h)
    if padding > 0:
        x_f = jnp.pad(x_f, ((0, 0), (0, 0), (0, 0), (padding, padding)))
    span = (l_out - 1) * stride + 1
    taps = [
        lax.slice_in_dim(x_f, kk * dilation, kk * dilation + span,
                         stride=stride, axis=3)                      # (b_i, c_in, b_j, l_out)
        for kk in range(ksize)
    ]
    x_col = jnp.concatenate(taps, axis=1)                            # (b_i, K, b_j, l_out)
    x_col = x_col.reshape(b_i, K, n_cols_raw)
    if n_cols_total != n_cols_raw:
        x_col = jnp.pad(x_col, ((0, 0), (0, 0), (0, n_cols_total - n_cols_raw)))
    x_bd = x_col.reshape(nb, GK, n_cols_total)                       # stack G groups on K

    # Weight rows ordered (tap kk, channel c) to match the im2col row order,
    # then packed block-diagonally over the G groups of each grid block.
    w_mat = jnp.transpose(weight, (0, 1, 3, 2)).reshape(b_i, out_ch, K)
    w_g = w_mat.reshape(nb, G, out_ch, K)
    eye = jnp.eye(G, dtype=weight.dtype)
    w_bd = jnp.einsum("ab,naok->naobk", eye, w_g).reshape(nb, M, GK)
    bias_bd = bias.reshape(nb, M, 1)

    # ---- Pallas call ----------------------------------------------------------
    out_flat = pl.pallas_call(
        _bd_conv_kernel,
        out_shape=jax.ShapeDtypeStruct((nb, M, n_cols_total), x.dtype),
        grid=(nb, n_col_tiles),
        in_specs=[
            pl.BlockSpec((1, GK, col_tile), lambda i, j: (i, 0, j)),
            pl.BlockSpec((1, M, GK), lambda i, j: (i, 0, 0)),
            pl.BlockSpec((1, M, 1), lambda i, j: (i, 0, 0)),
        ],
        out_specs=pl.BlockSpec((1, M, col_tile), lambda i, j: (i, 0, j)),
        compiler_params=pltpu.CompilerParams(
            dimension_semantics=("parallel", "parallel"),
            vmem_limit_bytes=48 * 1024 * 1024,       # <= 64 MiB/TC on v7x, fine on v5e/v6e
        ),
    )(x_bd, w_bd, bias_bd)

    # ---- layout plumbing back to the PyTorch output shape ---------------------
    out = out_flat.reshape(b_i, out_ch, n_cols_total)[:, :, :n_cols_raw]
    out = out.reshape(b_i, out_ch, b_j, l_out)
    return jnp.transpose(out, (0, 2, 1, 3))          # (b_i, b_j, out_ch, l_out)


def ref_batch_conv1d(x, weight, bias, *, stride=1, padding=0, dilation=1):
    """Pure-JAX reference mirroring the PyTorch module exactly (grouped Conv1d)."""
    b_i, b_j, c, h = x.shape
    _, out_ch, _, k = weight.shape
    xin = jnp.transpose(x, (1, 0, 2, 3)).reshape(b_j, b_i * c, h)
    w = weight.reshape(b_i * out_ch, c, k)
    out = lax.conv_general_dilated(
        xin, w,
        window_strides=(stride,), padding=[(padding, padding)],
        rhs_dilation=(dilation,), feature_group_count=b_i,
        dimension_numbers=("NCH", "OIH", "NCH"),
    )
    out = out + bias.reshape(b_i * out_ch)[None, :, None]
    l_out = out.shape[-1]
    return jnp.transpose(out.reshape(b_j, b_i, out_ch, l_out), (1, 0, 2, 3))


if __name__ == "__main__":
    # Module config (synthetic, deterministic init).
    in_channels, out_channels, kernel_size = 4, 8, 3
    stride, padding, dilation, groups = 1, 1, 1, 2
    b_i, b_j, h = groups, 3, 16          # b_i must equal `groups` for the module to be valid

    key = jax.random.PRNGKey(0)
    kx, kw, kb = jax.random.split(key, 3)
    x = jax.random.normal(kx, (b_i, b_j, in_channels, h), dtype=jnp.float32)
    # PyTorch Conv1d default init scale: U(-1/sqrt(fan_in), 1/sqrt(fan_in)), fan_in = c_in*k
    bound = 1.0 / jnp.sqrt(jnp.float32(in_channels * kernel_size))
    weight = jax.random.uniform(
        kw, (b_i, out_channels, in_channels, kernel_size),
        minval=-bound, maxval=bound, dtype=jnp.float32)
    bias = jax.random.uniform(
        kb, (b_i, out_channels), minval=-bound, maxval=bound, dtype=jnp.float32)

    out = batch_conv1d(x, weight, bias, stride=stride, padding=padding, dilation=dilation)
    out = jax.block_until_ready(out)

    ref = ref_batch_conv1d(x, weight, bias, stride=stride, padding=padding, dilation=dilation)
    l_out = (h + 2 * padding - dilation * (kernel_size - 1) - 1) // stride + 1
    assert out.shape == (b_i, b_j, out_channels, l_out), out.shape
    assert jnp.allclose(out, ref, atol=1e-4, rtol=1e-4), "mismatch vs. JAX reference"

    print("KERNEL_OK")
</pallas_src>

<mosaic_0001>
module attributes {stable_mosaic.version = 11 : i64} {
  func.func @_bd_conv_kernel(%arg0: i32, %arg1: i32, %arg2: memref<1x24x128xf32, #tpu.memory_space<vmem>>, %arg3: memref<1x16x24xf32, #tpu.memory_space<vmem>>, %arg4: memref<1x16x1xf32, #tpu.memory_space<vmem>>, %arg5: memref<1x16x128xf32, #tpu.memory_space<vmem>>) attributes {dimension_semantics = [#tpu.dimension_semantics<parallel>, #tpu.dimension_semantics<parallel>], iteration_bounds = array<i64: 1, 1>, scalar_prefetch = 0 : i64, scratch_operands = 0 : i64, tpu.core_type = #tpu.core_type<tc>, window_params = [{transform_indices = @transform_0, window_bounds = array<i64: 1, 24, 128>}, {transform_indices = @transform_1, window_bounds = array<i64: 1, 16, 24>}, {transform_indices = @transform_2, window_bounds = array<i64: 1, 16, 1>}, {transform_indices = @transform_3, window_bounds = array<i64: 1, 16, 128>}]} {
    %c0 = arith.constant 0 : index
    %c0_0 = arith.constant 0 : index
    %c0_1 = arith.constant 0 : index
    %0 = vector.load %arg3[%c0, %c0_0, %c0_1] : memref<1x16x24xf32, #tpu.memory_space<vmem>>, vector<1x16x24xf32>
    %1 = vector.shape_cast %0 : vector<1x16x24xf32> to vector<16x24xf32>
    %c0_2 = arith.constant 0 : index
    %c0_3 = arith.constant 0 : index
    %c0_4 = arith.constant 0 : index
    %2 = vector.load %arg2[%c0_2, %c0_3, %c0_4] : memref<1x24x128xf32, #tpu.memory_space<vmem>>, vector<1x24x128xf32>
    %3 = vector.shape_cast %2 : vector<1x24x128xf32> to vector<24x128xf32>
    %cst = arith.constant dense<0.000000e+00> : vector<16x128xf32>
    %4 = tpu.matmul %1, %3, %cst {dimension_numbers = #tpu.dot_dimension_numbers<[1], [0], [0], [1], [0, 0, 1, 1], [], []>} : vector<16x24xf32>, vector<24x128xf32>, vector<16x128xf32> -> vector<16x128xf32>
    %c0_5 = arith.constant 0 : index
    %c0_6 = arith.constant 0 : index
    %c0_7 = arith.constant 0 : index
    %5 = vector.load %arg4[%c0_5, %c0_6, %c0_7] : memref<1x16x1xf32, #tpu.memory_space<vmem>>, vector<1x16x1xf32>
    %6 = vector.shape_cast %5 : vector<1x16x1xf32> to vector<16x1xf32>
    %7 = vector.broadcast %6 : vector<16x1xf32> to vector<16x128xf32>
    %8 = arith.addf %4, %7 : vector<16x128xf32>
    %c0_8 = arith.constant 0 : index
    %c0_9 = arith.constant 0 : index
    %c0_10 = arith.constant 0 : index
    %9 = vector.load %arg5[%c0_8, %c0_9, %c0_10] : memref<1x16x128xf32, #tpu.memory_space<vmem>>, vector<1x16x128xf32>
    %10 = vector.shape_cast %9 : vector<1x16x128xf32> to vector<16x128xf32>
    %11 = vector.shape_cast %8 : vector<16x128xf32> to vector<1x16x128xf32>
    tpu.vector_store %arg5[%c0_8, %c0_9, %c0_10], %11 {strides = array<i32>} : memref<1x16x128xf32, #tpu.memory_space<vmem>>, vector<1x16x128xf32>,
    return
  }
  func.func @transform_0(%arg0: i32, %arg1: i32) -> (i32, i32, i32) {
    %c0_i32 = arith.constant 0 : i32
    %c0_i32_0 = arith.constant 0 : i32
    return %arg0, %c0_i32, %arg1 : i32, i32, i32
  }
  func.func @transform_1(%arg0: i32, %arg1: i32) -> (i32, i32, i32) {
    %c0_i32 = arith.constant 0 : i32
    %c0_i32_0 = arith.constant 0 : i32
    %c0_i32_1 = arith.constant 0 : i32
    return %arg0, %c0_i32, %c0_i32_0 : i32, i32, i32
  }
  func.func @transform_2(%arg0: i32, %arg1: i32) -> (i32, i32, i32) {
    %c0_i32 = arith.constant 0 : i32
    %c0_i32_0 = arith.constant 0 : i32
    %c0_i32_1 = arith.constant 0 : i32
    return %arg0, %c0_i32, %c0_i32_0 : i32, i32, i32
  }
  func.func @transform_3(%arg0: i32, %arg1: i32) -> (i32, i32, i32) {
    %c0_i32 = arith.constant 0 : i32
    %c0_i32_0 = arith.constant 0 : i32
    return %arg0, %c0_i32, %arg1 : i32, i32, i32
  }
}

</mosaic_0001>

<bundles_post_ra>
// kernel: tpu_custom_call.1
= control target key start
LH: loop header
LB: loop body
LE: loop exit
PB: predicated region body
PF: predicated region fallthrough
CT: control target
= control target key end

     0   :  { %8 = vsyncpa [#allocation3], 0  ;;  %s211_s0 = inlined_call_operand.hbm [shape: f32[1,24,128], index: 0, kind: input, shape index: {}]   ;;  %s212_s1 = inlined_call_operand.vmem [shape: f32[1,16,24], index: 1, kind: input, shape index: {}]   ;;  %s213_s2 = inlined_call_operand.vmem [shape: f32[1,16,1], index: 2, kind: input, shape index: {}]   ;;  %s214_s3 = inlined_call_operand.hbm [shape: f32[1,16,128], index: 3, kind: output, shape index: {}]  }
   0x1   :  { %9 = vsyncpa [#allocation4], 0  ;;  %s14_s14 = sshll.u32 %s211_s0, 4  ;;  %s162_s15 = smov [#allocation2]   ;;  %s15_s14 = int_to_ptr.hbm [resolvable:$true] %s14_s14 }
   0x2   :  { %s16_s16 = sshll.u32 %s162_s15, 4  ;;  %s163_s17 = smov 128   ;;  %s17_s16 = int_to_ptr.vmem [resolvable:$true] %s16_s16 }
   0x3   :  { %s164_s18 = smov 8  }
   0x4   :  { %22 = dma.hbm_to_vmem [thread:$0]  %s15_s14, 384, %s17_s16, [#allocation3], %s163_s17, %s163_s17, %s164_s18  }
   0x5   :  { %158 = dma.done.wait [#allocation3], 384  }
   0x6   :  { %159 = vsyncadd [#allocation3], 4294966912  ;;  %v165_v0 = vmov 0   ;;  %v36_v1 = vld [vmem:[%s213_s2] sm:$0xff]  ;;  %v35_v2 = vld [vmem:[#allocation2 + $0x10] sm:$0xff]  ;;  %vm48_vm0 = vcmask 195584  }
   0x7   :  { %109 = vset.pattern.permute.xlu0 %v165_v0  ;;  %v34_v3 = vld [vmem:[#allocation2 + $0x8] sm:$0xff]  ;;  %68 = vmatpush.msra.mxu0 %v35_v2  ;;  %v33_v4 = vld [vmem:[#allocation2] sm:$0xff]  ;;  %s166_s26 = smov [#allocation5]   ;;  %s86_s30 = sshll.u32 %s214_s3, 4  ;;  %s87_s30 = int_to_ptr.hbm [resolvable:$true] %s86_s30 }
   0x8   :  { %40 = vperm.xlu0 %109, %v36_v1   ;;  %101 = vmatpush.msra.mxu1 %v35_v2  ;;  %v31_v5 = vld [vmem:[%s212_s1] sm:$0xff]  ;;  %v32_v6 = vld [vmem:[%s212_s1 + $0x8] sm:$0xff]  ;;  %s84_s27 = sshll.u32 %s166_s26, 4  ;;  %s85_s27 = int_to_ptr.vmem [resolvable:$true] %s84_s27 }
   0x9   :  { %69 = vmatpush.msra.mxu0 %v34_v3  ;;  %v37_v7 = vld [vmem:[%s213_s2 + $0x8] sm:$0xff] }
   0xa   :  { %102 = vmatpush.msra.mxu1 %v34_v3 }
   0xb   :  { %70 = vmatpush.msra.mxu0 %v33_v4 }
   0xc   :  { %103 = vmatpush.msra.mxu1 %v33_v4  ;;  %99 = vmatmul.msk.f32.vlgmr.msra.gmra.mxu0 %vm48_vm0, %v31_v5 }
   0xd   :  { %100 = vmatmul.msk.f32.vlgmr.msra.gmra.mxu1 %vm48_vm0, %v32_v6 }
  0x10   :  { %45 = vperm.xlu0 %109, %v37_v7  }
  0x7a   :  { %v41_v8 = vpop.permute.xlu0 %40 }
  0x82   :  { %v46_v10 = vpop.permute.xlu0 %45 }
  0x89   :  { %v72_v9 = vpop.f32.mrf.mxu0 }
  0x8a   :  { %v73_v11 = vadd.f32 %v72_v9, %v41_v8  ;;  %v75_v12 = vpop.f32.mrf.mxu1 }
  0x8b   :  { %v76_v13 = vadd.f32 %v75_v12, %v46_v10 }
  0x8c   :  { %78 = vst [vmem:[#allocation5] sm:$0xff] %v73_v11 }
  0x8d   :  { %79 = vst [vmem:[#allocation5 + $0x8] sm:$0xff] %v76_v13 }
  0x8e   :  { %92 = dma.vmem_to_hbm [thread:$0]  %s85_s27, 256, %s87_s30, [#allocation4], %s163_s17, %s163_s17, %s164_s18  }
  0x8f   :  { %160 = dma.done.wait [#allocation4], 256  }
  0x90   :  { %161 = vsyncadd [#allocation4], 4294967040 }
  0x91   :  { %97 = vsyncpa [#allocation3], 1 }
  0x92   :  { %98 = vsyncpa [#allocation4], 1 }

</bundles_post_ra>
